<compile_context>
chip_gen: v6e
topology: v6e:2x2x1
jax: 0.10.0
libtpu: 0.0.40
codegen_flags: <defaults>
</compile_context>

<pallas_src>
import jax
import jax.numpy as jnp
from jax.experimental import pallas as pl
from jax.experimental.pallas import tpu as pltpu

_TWO_PASS_BLOCK_BYTES = 4 * 1024 * 1024     # per-block cap for the streaming path
_FUSED_MAX_SLAB_BYTES = 8 * 1024 * 1024     # (C, HW) slab cap for the fused path
_VMEM_LIMIT_BYTES = 48 * 1024 * 1024        # < 64 MiB physical VMEM on v7x


# ----------------------------- fused single pass -----------------------------

def _make_fused_kernel(C, HW):
    inv_hw = 1.0 / float(HW)

    def kernel(k_ref, x_ref, o_ref, m_scr):
        # k_ref : (3,) f32 conv taps in SMEM.
        # x_ref / o_ref : (1, C, HW) block (full per-batch slab, no partial blocks).
        # m_scr : (C + 16, 1) f32 VMEM scratch used to build the +/-1 channel
        #         shifts of the per-channel mean with plain offset slices.

        # Per-channel mean (f32 accumulation), reduced over the lane (HW) axis.
        s = jnp.sum(x_ref[0].astype(jnp.float32), axis=-1, keepdims=True)   # (C, 1)
        mean = s * inv_hw

        # Zero-padded 3-tap conv along C:
        #   y[c] = k0*mean[c-1] + k1*mean[c] + k2*mean[c+1]
        # Store mean at (sublane-aligned) offset 8; rows 7 and 8+C stay zero,
        # so the shifted reads pick up the zero padding at the boundaries.
        m_scr[...] = jnp.zeros_like(m_scr)
        m_scr[pl.ds(8, C), :] = mean
        m_prev = m_scr[pl.ds(7, C), :]
        m_next = m_scr[pl.ds(9, C), :]
        y = k_ref[0] * m_prev + k_ref[1] * mean + k_ref[2] * m_next

        scale = jax.nn.sigmoid(y).astype(o_ref.dtype)                       # (C, 1)
        o_ref[0] = x_ref[0] * scale

    return kernel


def _esa_fused(x2, taps):
    B, C, HW = x2.shape
    return pl.pallas_call(
        _make_fused_kernel(C, HW),
        out_shape=jax.ShapeDtypeStruct((B, C, HW), x2.dtype),
        grid_spec=pltpu.PrefetchScalarGridSpec(
            num_scalar_prefetch=0,
            grid=(B,),
            in_specs=[
                pl.BlockSpec(memory_space=pltpu.MemorySpace.SMEM),      # taps
                pl.BlockSpec((1, C, HW), lambda b: (b, 0, 0)),          # x
            ],
            out_specs=pl.BlockSpec((1, C, HW), lambda b: (b, 0, 0)),
            scratch_shapes=[pltpu.VMEM((C + 16, 1), jnp.float32)],
        ),
        compiler_params=pltpu.CompilerParams(
            dimension_semantics=("parallel",),
            vmem_limit_bytes=_VMEM_LIMIT_BYTES,
        ),
    )(taps, x2)


# ---------------------------- two-pass streaming ------------------------------

def _choose_hw_tile(C, HW, itemsize):
    """Largest lane-dense (multiple of 128) HW tile with C*tile under budget."""
    hw128 = pl.cdiv(HW, 128) * 128
    max_lanes = max(
        128, ((_TWO_PASS_BLOCK_BYTES // max(C * itemsize, 1)) // 128) * 128)
    if hw128 <= max_lanes:
        return hw128
    n = pl.cdiv(hw128, max_lanes)
    return pl.cdiv(pl.cdiv(hw128, n), 128) * 128


def _make_sum_kernel(HW, hw_tile):
    rem = HW % hw_tile   # valid lanes in the (possibly ragged) last HW tile

    def kernel(x_ref, s_ref):
        j = pl.program_id(1)

        @pl.when(j == 0)
        def _():
            s_ref[...] = jnp.zeros_like(s_ref)

        if rem == 0:
            s_ref[...] += jnp.sum(
                x_ref[...].astype(jnp.float32), axis=-1, keepdims=True)
        else:
            last = pl.num_programs(1) - 1

            @pl.when(j != last)
            def _():
                s_ref[...] += jnp.sum(
                    x_ref[...].astype(jnp.float32), axis=-1, keepdims=True)

            @pl.when(j == last)
            def _():
                # OOB lanes of the partial last block hold garbage: mask them.
                x = x_ref[...].astype(jnp.float32)
                lane = jax.lax.broadcasted_iota(jnp.int32, x.shape, 2)
                x = jnp.where(lane < rem, x, 0.0)
                s_ref[...] += jnp.sum(x, axis=-1, keepdims=True)

    return kernel


def _gate_kernel(x_ref, s_ref, o_ref):
    # The OOB tail of a partial last block is garbage * scale, but Pallas drops
    # the out-of-bounds part of the store, so no masking is needed here.
    o_ref[...] = x_ref[...] * s_ref[...]


def _esa_two_pass(x2, taps):
    B, C, HW = x2.shape
    dtype = x2.dtype
    itemsize = jnp.dtype(dtype).itemsize

    hw_tile = _choose_hw_tile(C, HW, itemsize)
    n_hw = pl.cdiv(HW, hw_tile)

    # Pass 1: per-(batch, channel) spatial sums; f32 accumulator resident across
    # the HW ("arbitrary", last) grid axis. Batch stays un-folded so the
    # "parallel" axis has >= 2 steps and feeds both v7x TensorCores.
    sums = pl.pallas_call(
        _make_sum_kernel(HW, hw_tile),
        out_shape=jax.ShapeDtypeStruct((B, C, 1), jnp.float32),
        grid_spec=pltpu.PrefetchScalarGridSpec(
            num_scalar_prefetch=0,
            grid=(B, n_hw),
            in_specs=[pl.BlockSpec((1, C, hw_tile), lambda b, h: (b, 0, h))],
            out_specs=pl.BlockSpec((1, C, 1), lambda b, h: (b, 0, 0)),
        ),
        compiler_params=pltpu.CompilerParams(
            dimension_semantics=("parallel", "arbitrary"),
            vmem_limit_bytes=_VMEM_LIMIT_BYTES,
        ),
    )(x2)

    # Tiny B*C glue in plain JAX: mean -> zero-padded 3-tap conv along C -> sigmoid.
    mean = sums[:, :, 0] * (1.0 / HW)
    mp = jnp.pad(mean, ((0, 0), (1, 1)))
    y = taps[0] * mp[:, :-2] + taps[1] * mp[:, 1:-1] + taps[2] * mp[:, 2:]
    scale = jax.nn.sigmoid(y).astype(dtype).reshape(B, C, 1)

    # Pass 2: streaming channel-wise gating, lane-dense over HW, both axes parallel.
    return pl.pallas_call(
        _gate_kernel,
        out_shape=jax.ShapeDtypeStruct((B, C, HW), dtype),
        grid_spec=pltpu.PrefetchScalarGridSpec(
            num_scalar_prefetch=0,
            grid=(B, n_hw),
            in_specs=[
                pl.BlockSpec((1, C, hw_tile), lambda b, h: (b, 0, h)),
                pl.BlockSpec((1, C, 1), lambda b, h: (b, 0, 0)),
            ],
            out_specs=pl.BlockSpec((1, C, hw_tile), lambda b, h: (b, 0, h)),
        ),
        compiler_params=pltpu.CompilerParams(
            dimension_semantics=("parallel", "parallel"),
            vmem_limit_bytes=_VMEM_LIMIT_BYTES,
        ),
    )(x2, scale)


# --------------------------------- wrapper ------------------------------------

def esa_forward(x, conv_w):
    """x: (B, C, H, W); conv_w: (1, 1, 3, 3) Conv2d(1,1,3,pad=1,bias=False) weight."""
    B, C, H, W = x.shape
    HW = H * W
    itemsize = jnp.dtype(x.dtype).itemsize

    x2 = x.reshape(B, C, HW)
    taps = conv_w[0, 0, :, 1].astype(jnp.float32)   # middle column = 1-D taps

    if C * HW * itemsize <= _FUSED_MAX_SLAB_BYTES:
        out = _esa_fused(x2, taps)
    else:
        out = _esa_two_pass(x2, taps)
    return out.reshape(B, C, H, W)


def esa_ref(x, conv_w):
    """Pure-JAX reference matching the PyTorch forward."""
    m = jnp.mean(x, axis=(2, 3))                    # (B, C)
    k = conv_w[0, 0, :, 1]
    mp = jnp.pad(m, ((0, 0), (1, 1)))
    y = k[0] * mp[:, :-2] + k[1] * mp[:, 1:-1] + k[2] * mp[:, 2:]
    s = jax.nn.sigmoid(y)[:, :, None, None]
    return x * s


if __name__ == "__main__":
    key = jax.random.PRNGKey(0)
    kx, kw, kx2 = jax.random.split(key, 3)

    # Deterministic synthetic Conv2d(1, 1, 3, padding=1, bias=False) weight.
    conv_w = jax.random.normal(kw, (1, 1, 3, 3), dtype=jnp.float32) * 0.3

    esa = jax.jit(esa_forward)

    # Small shape (module default): exercises the fused single-pass path.
    x = jax.random.normal(kx, (2, 4, 16, 16), dtype=jnp.float32)
    out = jax.block_until_ready(esa(x, conv_w))
    ref = esa_ref(x, conv_w)
    assert out.shape == x.shape
    assert jnp.allclose(out, ref, atol=1e-5, rtol=1e-5), "fused path mismatch"

    # Larger shape: exercises the two-pass streaming path with a ragged HW tile.
    x_big = jax.random.normal(kx2, (2, 128, 129, 129), dtype=jnp.float32)
    out_big = jax.block_until_ready(esa(x_big, conv_w))
    ref_big = esa_ref(x_big, conv_w)
    assert out_big.shape == x_big.shape
    assert jnp.allclose(out_big, ref_big, atol=1e-4, rtol=1e-4), "two-pass mismatch"

    print("KERNEL_OK")
</pallas_src>

<mosaic_0001>
module attributes {stable_mosaic.version = 11 : i64} {
  func.func @kernel(%arg0: i32, %arg1: memref<3xf32, #tpu.memory_space<smem>>, %arg2: memref<1x4x256xf32, #tpu.memory_space<vmem>>, %arg3: memref<1x4x256xf32, #tpu.memory_space<vmem>>, %arg4: memref<20x1xf32, #tpu.memory_space<vmem>>) attributes {dimension_semantics = [#tpu.dimension_semantics<parallel>], iteration_bounds = array<i64: 2>, scalar_prefetch = 0 : i64, scratch_operands = 1 : i64, tpu.core_type = #tpu.core_type<tc>, window_params = [{transform_indices = @transform_0, window_bounds = array<i64: 3>}, {transform_indices = @transform_1, window_bounds = array<i64: 1, 4, 256>}, {transform_indices = @transform_2, window_bounds = array<i64: 1, 4, 256>}]} {
    %c0 = arith.constant 0 : index
    %c0_0 = arith.constant 0 : index
    %c0_1 = arith.constant 0 : index
    %0 = vector.load %arg2[%c0, %c0_0, %c0_1] : memref<1x4x256xf32, #tpu.memory_space<vmem>>, vector<1x4x256xf32>
    %1 = vector.shape_cast %0 : vector<1x4x256xf32> to vector<4x256xf32>
    %cst = arith.constant dense<0.000000e+00> : vector<4xf32>
    %2 = vector.multi_reduction <add>, %1, %cst [1] : vector<4x256xf32> to vector<4xf32>
    %3 = vector.shape_cast %2 : vector<4xf32> to vector<4x1xf32>
    %cst_2 = arith.constant 3.906250e-03 : f32
    %4 = vector.broadcast %cst_2 : f32 to vector<4x1xf32>
    %5 = arith.mulf %3, %4 : vector<4x1xf32>
    %cst_3 = arith.constant 0.000000e+00 : f32
    %6 = vector.broadcast %cst_3 : f32 to vector<20x1xf32>
    %c0_4 = arith.constant 0 : index
    %c0_5 = arith.constant 0 : index
    %7 = vector.load %arg4[%c0_4, %c0_5] : memref<20x1xf32, #tpu.memory_space<vmem>>, vector<20x1xf32>
    tpu.vector_store %arg4[%c0_4, %c0_5], %6 {strides = array<i32>} : memref<20x1xf32, #tpu.memory_space<vmem>>, vector<20x1xf32>,
    %c8 = arith.constant 8 : index
    %c0_6 = arith.constant 0 : index
    %8 = vector.load %arg4[%c8, %c0_6] : memref<20x1xf32, #tpu.memory_space<vmem>>, vector<4x1xf32>
    tpu.vector_store %arg4[%c8, %c0_6], %5 {strides = array<i32>} : memref<20x1xf32, #tpu.memory_space<vmem>>, vector<4x1xf32>,
    %c7 = arith.constant 7 : index
    %c0_7 = arith.constant 0 : index
    %9 = vector.load %arg4[%c7, %c0_7] : memref<20x1xf32, #tpu.memory_space<vmem>>, vector<4x1xf32>
    %c9 = arith.constant 9 : index
    %c0_8 = arith.constant 0 : index
    %10 = vector.load %arg4[%c9, %c0_8] : memref<20x1xf32, #tpu.memory_space<vmem>>, vector<4x1xf32>
    %c0_9 = arith.constant 0 : index
    %11 = memref.load %arg1[%c0_9] : memref<3xf32, #tpu.memory_space<smem>>
    %12 = vector.broadcast %11 : f32 to vector<4x1xf32>
    %13 = arith.mulf %12, %9 : vector<4x1xf32>
    %c1 = arith.constant 1 : index
    %14 = memref.load %arg1[%c1] : memref<3xf32, #tpu.memory_space<smem>>
    %15 = vector.broadcast %14 : f32 to vector<4x1xf32>
    %16 = arith.mulf %15, %5 : vector<4x1xf32>
    %17 = arith.addf %13, %16 : vector<4x1xf32>
    %c2 = arith.constant 2 : index
    %18 = memref.load %arg1[%c2] : memref<3xf32, #tpu.memory_space<smem>>
    %19 = vector.broadcast %18 : f32 to vector<4x1xf32>
    %20 = arith.mulf %19, %10 : vector<4x1xf32>
    %21 = arith.addf %17, %20 : vector<4x1xf32>
    %22 = arith.negf %21 : vector<4x1xf32>
    %23 = math.exp %22 : vector<4x1xf32>
    %cst_10 = arith.constant 1.000000e+00 : f32
    %24 = vector.broadcast %cst_10 : f32 to vector<4x1xf32>
    %25 = arith.addf %24, %23 : vector<4x1xf32>
    %26 = arith.divf %24, %25 : vector<4x1xf32>
    %c0_11 = arith.constant 0 : index
    %c0_12 = arith.constant 0 : index
    %c0_13 = arith.constant 0 : index
    %27 = vector.load %arg2[%c0_11, %c0_12, %c0_13] : memref<1x4x256xf32, #tpu.memory_space<vmem>>, vector<1x4x256xf32>
    %28 = vector.shape_cast %27 : vector<1x4x256xf32> to vector<4x256xf32>
    %29 = vector.broadcast %26 : vector<4x1xf32> to vector<4x256xf32>
    %30 = arith.mulf %28, %29 : vector<4x256xf32>
    %c0_14 = arith.constant 0 : index
    %c0_15 = arith.constant 0 : index
    %c0_16 = arith.constant 0 : index
    %31 = vector.load %arg3[%c0_14, %c0_15, %c0_16] : memref<1x4x256xf32, #tpu.memory_space<vmem>>, vector<1x4x256xf32>
    %32 = vector.shape_cast %31 : vector<1x4x256xf32> to vector<4x256xf32>
    %33 = vector.shape_cast %30 : vector<4x256xf32> to vector<1x4x256xf32>
    tpu.vector_store %arg3[%c0_14, %c0_15, %c0_16], %33 {strides = array<i32>} : memref<1x4x256xf32, #tpu.memory_space<vmem>>, vector<1x4x256xf32>,
    return
  }
  func.func @transform_0(%arg0: i32) -> i32 {
    %c0_i32 = arith.constant 0 : i32
    %c0_i32_0 = arith.constant 0 : i32
    return %c0_i32 : i32
  }
  func.func @transform_1(%arg0: i32) -> (i32, i32, i32) {
    %c0_i32 = arith.constant 0 : i32
    %c0_i32_0 = arith.constant 0 : i32
    %c0_i32_1 = arith.constant 0 : i32
    return %arg0, %c0_i32, %c0_i32_0 : i32, i32, i32
  }
  func.func @transform_2(%arg0: i32) -> (i32, i32, i32) {
    %c0_i32 = arith.constant 0 : i32
    %c0_i32_0 = arith.constant 0 : i32
    %c0_i32_1 = arith.constant 0 : i32
    return %arg0, %c0_i32, %c0_i32_0 : i32, i32, i32
  }
}

</mosaic_0001>

<bundles_post_ra>
// kernel: esa_forward.1
= control target key start
LH: loop header
LB: loop body
LE: loop exit
PB: predicated region body
PF: predicated region fallthrough
CT: control target
= control target key end

     0   :  { %7 = vsyncpa [#allocation4], 0  ;;  %s368_s9 = smov 0   ;;  %s415_s0 = inlined_call_operand.vmem [shape: f32[3], index: 0, kind: input, shape index: {}]   ;;  %s416_s1 = inlined_call_operand.vmem [shape: f32[2,4,256], index: 1, kind: input, shape index: {}]   ;;  %s417_s2 = inlined_call_operand.vmem [shape: f32[2,4,256], index: 2, kind: output, shape index: {}]  }
   0x1 LB: > { %s374_s10 = sadd.s32 4294967295, %s347_s9   ;;  %p278_p0 = scmp.ge.s32.totalorder %s347_s9, 1  ;;  %s347_s9 = sphi %s368_s9, %s13_s9  }
   0x2   : > { %p91_p1 = scmp.lt.s32.totalorder %s347_s9, 3  ;;  %s104_s13 = sshll.u32 %s415_s0, 4  ;;  %s105_s13 = int_to_ptr.vmem [resolvable:$true] %s104_s13 }
   0x3   : > { %p302_p3 = scmp.eq.s32.totalorder %s374_s10, 0  ;;  %s322_s15 = scalar_lea.vmem %s105_s13, 16 }
   0x4   : > { %p381_p2 = pnand %p278_p0, %p91_p1  ;;  %p323_p6 = scmp.ne.s32.totalorder %s105_s13, %s322_s15 }
   0x5   : > { %p330_p10 = scmp.lt.s32.totalorder %s105_s13, %s105_s13  ;;  %p331_p11 = scmp.lt.s32.totalorder %s322_s15, %s322_s15 }
   0x6   : > { %p298_p4 = pneg %p381_p2 }
   0x7   : > { %p332_p12 = por %p331_p11, %p330_p10 }
   0x8   : > { %p299_p5 = pnand %p302_p3, %p298_p4 }
   0xa   : > { %p324_p7 = pneg %p299_p5 }
   0xc   : > { %p325_p8 = pnand %p324_p7, %p323_p6 }
   0xe   : > { %p326_p9 = pneg %p325_p8 }
  0x10   : > { %p333_p13 = pnand %p332_p12, %p326_p9 }
  0x12   : > { %336 = shalt.err (!%p333_p13)
}
  0x13   : > { %s349_s16 = smov [#allocation3]   ;;  %125 = sbr.rel (%p381_p2) target bundleno = 353 (0x161), region = 28 }
  0x14   : > { %301 = dma.vmem_to_smem (!%p299_p5), %s105_s13, 16, %s349_s16, [#allocation4]  }
  0x18   : > { %342 = dma.done.wait (%p302_p3), [#allocation4], 16  }
  0x19   : > { %344 = vsyncadd (%p302_p3), [#allocation4], 4294967280 }
  0x1a   : > { %131 = sfence }
  0x1b   : > { %p148_p0 = scmp.lt.s32.totalorder %s374_s10, 1  ;;  %vm169_vm0 = vcmask 7168   ;;  %vm172_vm1 = vcmask 3072   ;;  %v350_v0 = vmov 0.0   ;;  %vm162_vm2 = vcmask 1043456   ;;  %s177_s21 = sld [smem:[#allocation3]] }
  0x1c   : > { %170 = vst.msk [vmem:[#allocation2] sm:$0xff] %vm169_vm0, %v350_v0  ;;  %171 = vst.msk [vmem:[#allocation2 + $0x8] sm:$0xff] %vm169_vm0, %v350_v0  ;;  %v351_v6 = vmov 0   ;;  %s287_s22 = sld [smem:[#allocation3 + $0x1]]  ;;  %v352_v23 = vmov 839922192   ;;  %v202_v25 = vlaneseq }
  0x1d   : > { %s420_s10 = smov (!%p148_p0, %s374_s10), 1  ;;  %316 = vset.pattern.permute.xlu0 %v351_v6  ;;  %s288_s23 = sld [smem:[#allocation3 + $0x2]]  ;;  %v200_v24 = vunpack.c.l.s4 %v352_v23 }
  0x1e   : > { %s292_s17 = sshll.u32 %s420_s10, 3  ;;  %v203_v27 = vshrl.u32 %v202_v25, 7 }
  0x1f   : > { %s152_s20 = scalar_lea.vmem %s416_s1, %s292_s17  ;;  %v201_v26 = vunpack.c.0.s8 %v200_v24  ;;  %s157_s26 = scalar_lea.vmem %s417_s2, %s292_s17 }
  0x20   : > { %v158_v1 = vld [vmem:[%s152_s20] sm:$0xff] }
  0x21   : > { %v160_v2 = vcombine.high %v158_v1, %v158_v1  ;;  %v163_v3 = vsel %vm162_vm2, %v158_v1, 0.0  ;;  %v178_v9 = vstv %s177_s21  ;;  %v204_v28 = vsub.s32 %v201_v26, %v203_v27 }
  0x22   : > { %v181_v10 = vstv %s287_s22 }
  0x23   : > { %v164_v4 = vsel %vm162_vm2, %v160_v2, 0.0  ;;  %v185_v11 = vstv %s288_s23 }
  0x24   : > { %v165_v5 = vadd.f32 %v164_v4, %v163_v3 }
  0x26   : > { %166 = vadd.xlane.f32.xlu0 %v165_v5 }
  0xaf   : > { %v167_v7 = vpop.xlane.xlu0 %166 }
  0xb0   : > { %v168_v8 = vmul.f32 0.00390625, %v167_v7 }
  0xb2   : > { %174 = vst.msk [vmem:[#allocation2 + $0x8] sm:$0xf] %vm172_vm1, %v168_v8  ;;  %v182_v15 = vmul.f32 %v181_v10, %v168_v8 }
  0xb9   : > { %v175_v12 = vld [vmem:[#allocation2 + $0x7] sm:$0xf] }
  0xba   : > { %v176_v13 = vld [vmem:[#allocation2 + $0x9] sm:$0xf]  ;;  %v179_v14 = vmul.f32 %v178_v9, %v175_v12 }
  0xbb   : > { %v186_v17 = vmul.f32 %v185_v11, %v176_v13 }
  0xbc   : > { %v183_v16 = vadd.f32 %v182_v15, %v179_v14 }
  0xbe   : > { %v187_v18 = vadd.f32 %v186_v17, %v183_v16 }
  0xc0   : > { %v289_v19 = vmul.f32 -1.442695, %v187_v18 }
  0xc2   : > { %318 = vpow2.f32 %v289_v19 }
  0xcf   : > { %v319_v20 = vpop.eup %318 }
  0xd0   : > { %v191_v21 = vadd.f32 1.0, %v319_v20 }
  0xd2   : > { %320 = vrcp.f32 %v191_v21 }
  0xdf   : > { %v321_v22 = vpop.eup %320 }
  0xe0   : > { %197 = vperm.xlu0 %316, %v321_v22  }
 0x15b   : > { %v198_v29 = vpop.permute.xlu0 %197 }
 0x15c   : > { %v205_v30 = vrot.slane %v198_v29, %v204_v28 }
 0x15e   : > { %v207_v31 = vmul.f32 %v205_v30, %v158_v1 }
 0x160   : > { %208 = vst [vmem:[%s157_s26] sm:$0xff] %v207_v31 }
 0x161 PF: > { %s13_s9 = sadd.s32 1, %s347_s9  }
 0x162   : > { %p10_p1 = scmp.ge.s32.totalorder %s13_s9, 4  }
 0x164   :  { %12 = sbr.rel (!%p10_p1) target bundleno = 1 (0x1), region = 63 }
 0x169   :  { %230 = vsyncpa [#allocation4], 1 }
 0x16a   :  { %232 = vsyncpa [#allocation4 + $0x1], 1 }

</bundles_post_ra>
